<compile_context>
chip_gen: v7x
topology: tpu7x:2x2x1
jax: 0.10.0
libtpu: 0.0.40
codegen_flags: <defaults>
</compile_context>

<pallas_src>
import functools
import itertools

import jax
import jax.numpy as jnp
from jax.experimental import pallas as pl
from jax.experimental.pallas import tpu as pltpu


_SMALL_BYTES = 2 * 1024 * 1024   # in+out below this may take the single-shot path
_UNROLL_MAX = 16                 # max statically unrolled copies (vreg pressure)
_BATCH_MAX = 64                  # max batch-fused leading dim (in-kernel unroll bound)


def _vmem_budgets():
    """(slab_byte_cap, vmem_limit_bytes) tuned per TPU generation."""
    try:
        vmem = pltpu.get_tpu_info().vmem_capacity_bytes
    except Exception:
        vmem = None
    if vmem is not None and vmem >= 100 * 1024 * 1024:
        # v5e / v6e: 128 MiB physical VMEM -> large slabs, generous scoped limit.
        return 8 * 1024 * 1024, 64 * 1024 * 1024
    # v7x (64 MiB) or unknown: 2 bufs x (in+out slab) = 16 MiB, well under 40 MiB.
    return 4 * 1024 * 1024, 40 * 1024 * 1024


def _simplify_permutation(shape, ordering):
    """Drop size-1 axes and merge runs of input axes that remain adjacent and
    in order under the permutation.  Returns (coarse_shape, coarse_ordering)."""
    keep = [a for a in range(len(shape)) if shape[a] != 1]
    if not keep:
        return (), ()
    new_id = {a: i for i, a in enumerate(keep)}
    shape1 = [shape[a] for a in keep]
    ord1 = [new_id[a] for a in ordering if a in new_id]

    groups = []  # [first_axis, last_axis] runs of consecutive input axes
    for a in ord1:
        if groups and groups[-1][1] + 1 == a:
            groups[-1][1] = a
        else:
            groups.append([a, a])
    starts = sorted(g[0] for g in groups)
    coarse_id = {s: i for i, s in enumerate(starts)}
    coarse_shape = [1] * len(groups)
    coarse_ord = []
    for g in groups:
        size = 1
        for a in range(g[0], g[1] + 1):
            size *= shape1[a]
        cid = coarse_id[g[0]]
        coarse_shape[cid] = size
        coarse_ord.append(cid)
    return tuple(coarse_shape), tuple(coarse_ord)


def _divisors(n):
    ds, i = set(), 1
    while i * i <= n:
        if n % i == 0:
            ds.add(i)
            ds.add(n // i)
        i += 1
    return ds


def _best_divisor(n, limit, granules=(128, 8)):
    """Largest divisor of n that is <= limit, preferring lane/sublane-friendly
    multiples (128, then 8)."""
    limit = max(1, min(n, limit))
    cands = [d for d in _divisors(n) if d <= limit]
    for g in granules:
        nice = [d for d in cands if d % g == 0]
        if nice:
            return max(nice)
    return max(cands)


# ---- kernel bodies ---------------------------------------------------------

def _block_kernel(in_ref, out_ref, *, perm):
    """Copy / permute one slab.  By construction perm is identity, (1,0) or
    (0,2,1); the last case is a batched last-two-dims transpose, statically
    unrolled over the (<= _BATCH_MAX) leading batch dim."""
    nd = len(perm)
    if perm == tuple(range(nd)):
        out_ref[...] = in_ref[...]          # lane-dense streaming copy
    elif nd == 2:
        out_ref[...] = in_ref[...].T        # 2-D lane<->sublane transpose (XLU)
    else:
        assert perm == (0, 2, 1), perm
        for b in range(in_ref.shape[0]):
            out_ref[b] = in_ref[b].T


def _unrolled_kernel(in_ref, out_ref, *, copies, swap):
    # Small tensors: whole coarse arrays resident in VMEM, outer axes statically
    # unrolled (<= _UNROLL_MAX slabs) -> no per-grid-step overhead.
    for in_idx, out_idx in copies:
        tile = in_ref[in_idx]
        if swap:
            tile = tile.T
        out_ref[out_idx] = tile


# ---- wrapper ---------------------------------------------------------------

def permute(x, ordering):
    """out = jnp.transpose(x, ordering), computed by a Pallas TPU kernel."""
    ordering = tuple(int(a) for a in ordering)
    nd = x.ndim
    assert sorted(ordering) == list(range(nd)), f"bad ordering {ordering}"
    out_shape = tuple(x.shape[a] for a in ordering)

    if nd == 0 or x.size == 0:
        return jnp.reshape(x, out_shape)

    shape_c, ord_c = _simplify_permutation(x.shape, ordering)
    n = len(shape_c)
    if n <= 1 or ord_c == tuple(range(n)):
        # Identity after simplification: pure metadata change, no data movement.
        return jnp.reshape(x, out_shape)

    itemsize = x.dtype.itemsize
    out_shape_c = tuple(shape_c[a] for a in ord_c)
    inv = [0] * n
    for j, a in enumerate(ord_c):
        inv[a] = j

    swap = ord_c[-1] != n - 1        # does the output lane axis differ from input's?
    p = ord_c[-1]                    # input axis that becomes the output lane axis
    total_bytes = 2 * x.size * itemsize
    slab_cap, vmem_limit = _vmem_budgets()
    cap_elems = max(1, slab_cap // itemsize)
    cparams = pltpu.CompilerParams(vmem_limit_bytes=vmem_limit)
    cost = pl.CostEstimate(flops=0, transcendentals=0, bytes_accessed=total_bytes)

    # Lane-sparse permuted output (< 128): every store would be a masked
    # vst.msk partial store (biggest measured lever), so let XLA handle big ones.
    # TODO(synk): lane-dense two-pass restructure (keep the input lane as the
    # output lane, relayout in a second lane-dense pass) instead of falling back.
    if swap and shape_c[p] < 128 and total_bytes > _SMALL_BYTES:
        return jnp.transpose(x, ordering)

    x_c = jnp.reshape(x, shape_c)

    # -------- single-shot path: tiny tensors, few unrolled slab copies --------
    if total_bytes <= _SMALL_BYTES:
        if swap:
            inner_in = {p, n - 1}
        else:
            k = 1
            while k < n - 1 and ord_c[n - k - 1] < ord_c[n - k]:
                k += 1
            inner_in = {ord_c[i] for i in range(n - k, n)}
        inner_out = {inv[a] for a in inner_in}
        outer_out = [j for j in range(n) if j not in inner_out]
        n_copies = 1
        for j in outer_out:
            n_copies *= out_shape_c[j]
        if n_copies <= _UNROLL_MAX:
            copies = []
            for combo in itertools.product(*[range(out_shape_c[j]) for j in outer_out]):
                at = dict(zip(outer_out, combo))
                in_idx = tuple(slice(None) if a in inner_in else at[inv[a]]
                               for a in range(n))
                out_idx = tuple(slice(None) if j in inner_out else at[j]
                                for j in range(n))
                copies.append((in_idx, out_idx))
            kernel = functools.partial(_unrolled_kernel, copies=copies, swap=swap)
            out_c = pl.pallas_call(
                kernel,
                out_shape=jax.ShapeDtypeStruct(out_shape_c, x.dtype),
                compiler_params=cparams,
                cost_estimate=cost,
            )(x_c)
            return jnp.reshape(out_c, out_shape)

    # -------- blocked / pipelined path --------
    # block[j] = block size along output axis j (shared with input axis ord_c[j]):
    #   == dim      -> fully inside every slab (not a grid axis)
    #   1 < b < dim -> partially blocked grid axis (divisor of dim, no ragged edge)
    #   == 1        -> squeezed grid axis
    block = [1] * n

    if not swap:
        # Copy path: output lane axis == input lane axis.  Fuse the byte-capped
        # strictly-increasing suffix of ord_c; when the next axis would overflow
        # the cap, PARTIALLY block it (multiple of 8) instead of dropping it.
        d_last = shape_c[n - 1]
        if d_last * itemsize <= slab_cap:
            block[n - 1] = d_last
            blk_elems = d_last
            j = n - 2
            while j >= 0 and ord_c[j] < ord_c[j + 1]:
                d = shape_c[ord_c[j]]
                if blk_elems * d <= cap_elems:
                    block[j] = d
                    blk_elems *= d
                    j -= 1
                    continue
                b = _best_divisor(d, cap_elems // blk_elems, granules=(8,))
                if b > 1 and b % 8 == 0:
                    block[j] = b
                break
        else:
            # Huge lane dim: tile it by itself (still a pure copy).
            b = _best_divisor(d_last, cap_elems, granules=(128,))
            if b % 128 != 0:
                return jnp.transpose(x, ordering)   # pathological factorization
            block[n - 1] = b
    else:
        # Transpose path: output lane axis p, input lane axis q = n-1.  Byte-cap
        # both tiles with 128-aligned divisors so both layouts stay tile-aligned.
        q = n - 1
        dp, dq = shape_c[p], shape_c[q]
        tp, tq = dp, dq
        while tp * tq > cap_elems:
            if tp >= tq and tp > 8:
                tp = _best_divisor(dp, max(8, tp // 2), granules=(128, 8))
            elif tq > 8:
                tq = _best_divisor(dq, max(8, tq // 2), granules=(128, 8))
            else:
                break
        if not ((tp == dp or tp % 128 == 0) and (tq == dq or tq % 128 == 0)):
            return jnp.transpose(x, ordering)       # pathological factorization
        block[n - 1] = tp
        block[inv[q]] = tq
        # Small 2-D slab: fuse an extra batch axis so per-step overhead amortizes.
        if tp == dp and tq == dq and tp * tq * itemsize <= slab_cap // 4:
            cands = [a for a in range(n) if a < p and inv[a] < inv[q]]
            if cands:
                a = max(cands, key=lambda ax: shape_c[ax])
                bb = _best_divisor(shape_c[a],
                                   min(cap_elems // (tp * tq), _BATCH_MAX),
                                   granules=(8,))
                if bb > 1:
                    block[inv[a]] = bb

    # In-kernel permutation of the kept (non-squeezed) block axes.
    kept_in = [a for a in range(n) if block[inv[a]] > 1]
    kept_out = [j for j in range(n) if block[j] > 1]
    pos_in = {a: r for r, a in enumerate(kept_in)}
    kperm = tuple(pos_in[ord_c[j]] for j in kept_out)
    kernel = functools.partial(_block_kernel, perm=kperm)

    grid_axes = [j for j in range(n) if block[j] < out_shape_c[j]]

    if not grid_axes:
        # Everything fused under the cap: one invocation, whole arrays resident.
        out_c = pl.pallas_call(
            kernel,
            out_shape=jax.ShapeDtypeStruct(out_shape_c, x.dtype),
            compiler_params=cparams,
            cost_estimate=cost,
        )(x_c)
        return jnp.reshape(out_c, out_shape)

    grid = tuple(out_shape_c[j] // block[j] for j in grid_axes)
    gpos = {j: t for t, j in enumerate(grid_axes)}

    in_block = tuple(None if block[inv[a]] == 1 else block[inv[a]] for a in range(n))
    out_block = tuple(None if block[j] == 1 else block[j] for j in range(n))

    def in_index(*g):
        return tuple(g[gpos[inv[a]]] if inv[a] in gpos else 0 for a in range(n))

    def out_index(*g):
        return tuple(g[gpos[j]] if j in gpos else 0 for j in range(n))

    out_c = pl.pallas_call(
        kernel,
        out_shape=jax.ShapeDtypeStruct(out_shape_c, x.dtype),
        grid=grid,
        in_specs=[pl.BlockSpec(in_block, in_index)],
        out_specs=pl.BlockSpec(out_block, out_index),
        compiler_params=pltpu.CompilerParams(
            # Disjoint output slabs -> all parallel; shards across v7x's 2 TCs.
            dimension_semantics=("parallel",) * len(grid),
            vmem_limit_bytes=vmem_limit,
        ),
        cost_estimate=cost,
    )(x_c)
    return jnp.reshape(out_c, out_shape)


class Permute:
    """Mirror of the PyTorch module: Permute(ordering)(frames)."""

    def __init__(self, ordering):
        self.ordering = tuple(ordering)

    def __call__(self, frames):
        return permute(frames, self.ordering)


if __name__ == "__main__":
    key = jax.random.PRNGKey(0)
    keys = jax.random.split(key, 6)

    def check(shape, ordering, k):
        x = jax.random.normal(k, shape, dtype=jnp.float32)
        out = jax.block_until_ready(Permute(ordering)(x))
        ref = jnp.transpose(x, ordering)
        assert out.shape == ref.shape and out.dtype == ref.dtype, (shape, ordering)
        assert bool(jnp.array_equal(out, ref)), (shape, ordering)

    # Default frame layout (C, T, H, W) = (4, 8, 16, 16).
    check((4, 8, 16, 16), (1, 0, 2, 3), keys[0])     # small single-shot copy path
    check((4, 8, 16, 16), (0, 1, 3, 2), keys[1])     # small batched-transpose path
    # Larger inputs exercise the blocked / pipelined paths.
    check((8, 16, 32, 128), (1, 0, 2, 3), keys[2])   # gridded lane-dense copy
    check((4, 8, 256, 128), (0, 1, 3, 2), keys[3])   # fused batched transpose
    check((2, 8, 512, 256), (0, 1, 3, 2), keys[4])   # gridded batched transpose
    check((2048, 1024), (1, 0), keys[5])             # byte-capped 2-D transpose

    print("KERNEL_OK")
</pallas_src>

<mosaic_0001>
module attributes {stable_mosaic.version = 11 : i64} {
  func.func @_unrolled_kernel(%arg0: memref<4x8x256xf32, #tpu.memory_space<vmem>>, %arg1: memref<8x4x256xf32, #tpu.memory_space<vmem>>) attributes {dimension_semantics = [], scalar_prefetch = 0 : i64, scratch_operands = 0 : i64, tpu.core_type = #tpu.core_type<tc>} {
    %c0 = arith.constant 0 : index
    %c0_0 = arith.constant 0 : index
    %c0_1 = arith.constant 0 : index
    %0 = vector.load %arg0[%c0, %c0_0, %c0_1] : memref<4x8x256xf32, #tpu.memory_space<vmem>>, vector<4x1x256xf32>
    %1 = vector.shape_cast %0 : vector<4x1x256xf32> to vector<4x256xf32>
    %c0_2 = arith.constant 0 : index
    %c0_3 = arith.constant 0 : index
    %c0_4 = arith.constant 0 : index
    %2 = vector.load %arg1[%c0_2, %c0_3, %c0_4] : memref<8x4x256xf32, #tpu.memory_space<vmem>>, vector<1x4x256xf32>
    %3 = vector.shape_cast %2 : vector<1x4x256xf32> to vector<4x256xf32>
    %4 = vector.shape_cast %1 : vector<4x256xf32> to vector<1x4x256xf32>
    tpu.vector_store %arg1[%c0_2, %c0_3, %c0_4], %4 {strides = array<i32>} : memref<8x4x256xf32, #tpu.memory_space<vmem>>, vector<1x4x256xf32>,
    %c0_5 = arith.constant 0 : index
    %c1 = arith.constant 1 : index
    %c0_6 = arith.constant 0 : index
    %5 = vector.load %arg0[%c0_5, %c1, %c0_6] : memref<4x8x256xf32, #tpu.memory_space<vmem>>, vector<4x1x256xf32>
    %6 = vector.shape_cast %5 : vector<4x1x256xf32> to vector<4x256xf32>
    %c1_7 = arith.constant 1 : index
    %c0_8 = arith.constant 0 : index
    %c0_9 = arith.constant 0 : index
    %7 = vector.load %arg1[%c1_7, %c0_8, %c0_9] : memref<8x4x256xf32, #tpu.memory_space<vmem>>, vector<1x4x256xf32>
    %8 = vector.shape_cast %7 : vector<1x4x256xf32> to vector<4x256xf32>
    %9 = vector.shape_cast %6 : vector<4x256xf32> to vector<1x4x256xf32>
    tpu.vector_store %arg1[%c1_7, %c0_8, %c0_9], %9 {strides = array<i32>} : memref<8x4x256xf32, #tpu.memory_space<vmem>>, vector<1x4x256xf32>,
    %c0_10 = arith.constant 0 : index
    %c2 = arith.constant 2 : index
    %c0_11 = arith.constant 0 : index
    %10 = vector.load %arg0[%c0_10, %c2, %c0_11] : memref<4x8x256xf32, #tpu.memory_space<vmem>>, vector<4x1x256xf32>
    %11 = vector.shape_cast %10 : vector<4x1x256xf32> to vector<4x256xf32>
    %c2_12 = arith.constant 2 : index
    %c0_13 = arith.constant 0 : index
    %c0_14 = arith.constant 0 : index
    %12 = vector.load %arg1[%c2_12, %c0_13, %c0_14] : memref<8x4x256xf32, #tpu.memory_space<vmem>>, vector<1x4x256xf32>
    %13 = vector.shape_cast %12 : vector<1x4x256xf32> to vector<4x256xf32>
    %14 = vector.shape_cast %11 : vector<4x256xf32> to vector<1x4x256xf32>
    tpu.vector_store %arg1[%c2_12, %c0_13, %c0_14], %14 {strides = array<i32>} : memref<8x4x256xf32, #tpu.memory_space<vmem>>, vector<1x4x256xf32>,
    %c0_15 = arith.constant 0 : index
    %c3 = arith.constant 3 : index
    %c0_16 = arith.constant 0 : index
    %15 = vector.load %arg0[%c0_15, %c3, %c0_16] : memref<4x8x256xf32, #tpu.memory_space<vmem>>, vector<4x1x256xf32>
    %16 = vector.shape_cast %15 : vector<4x1x256xf32> to vector<4x256xf32>
    %c3_17 = arith.constant 3 : index
    %c0_18 = arith.constant 0 : index
    %c0_19 = arith.constant 0 : index
    %17 = vector.load %arg1[%c3_17, %c0_18, %c0_19] : memref<8x4x256xf32, #tpu.memory_space<vmem>>, vector<1x4x256xf32>
    %18 = vector.shape_cast %17 : vector<1x4x256xf32> to vector<4x256xf32>
    %19 = vector.shape_cast %16 : vector<4x256xf32> to vector<1x4x256xf32>
    tpu.vector_store %arg1[%c3_17, %c0_18, %c0_19], %19 {strides = array<i32>} : memref<8x4x256xf32, #tpu.memory_space<vmem>>, vector<1x4x256xf32>,
    %c0_20 = arith.constant 0 : index
    %c4 = arith.constant 4 : index
    %c0_21 = arith.constant 0 : index
    %20 = vector.load %arg0[%c0_20, %c4, %c0_21] : memref<4x8x256xf32, #tpu.memory_space<vmem>>, vector<4x1x256xf32>
    %21 = vector.shape_cast %20 : vector<4x1x256xf32> to vector<4x256xf32>
    %c4_22 = arith.constant 4 : index
    %c0_23 = arith.constant 0 : index
    %c0_24 = arith.constant 0 : index
    %22 = vector.load %arg1[%c4_22, %c0_23, %c0_24] : memref<8x4x256xf32, #tpu.memory_space<vmem>>, vector<1x4x256xf32>
    %23 = vector.shape_cast %22 : vector<1x4x256xf32> to vector<4x256xf32>
    %24 = vector.shape_cast %21 : vector<4x256xf32> to vector<1x4x256xf32>
    tpu.vector_store %arg1[%c4_22, %c0_23, %c0_24], %24 {strides = array<i32>} : memref<8x4x256xf32, #tpu.memory_space<vmem>>, vector<1x4x256xf32>,
    %c0_25 = arith.constant 0 : index
    %c5 = arith.constant 5 : index
    %c0_26 = arith.constant 0 : index
    %25 = vector.load %arg0[%c0_25, %c5, %c0_26] : memref<4x8x256xf32, #tpu.memory_space<vmem>>, vector<4x1x256xf32>
    %26 = vector.shape_cast %25 : vector<4x1x256xf32> to vector<4x256xf32>
    %c5_27 = arith.constant 5 : index
    %c0_28 = arith.constant 0 : index
    %c0_29 = arith.constant 0 : index
    %27 = vector.load %arg1[%c5_27, %c0_28, %c0_29] : memref<8x4x256xf32, #tpu.memory_space<vmem>>, vector<1x4x256xf32>
    %28 = vector.shape_cast %27 : vector<1x4x256xf32> to vector<4x256xf32>
    %29 = vector.shape_cast %26 : vector<4x256xf32> to vector<1x4x256xf32>
    tpu.vector_store %arg1[%c5_27, %c0_28, %c0_29], %29 {strides = array<i32>} : memref<8x4x256xf32, #tpu.memory_space<vmem>>, vector<1x4x256xf32>,
    %c0_30 = arith.constant 0 : index
    %c6 = arith.constant 6 : index
    %c0_31 = arith.constant 0 : index
    %30 = vector.load %arg0[%c0_30, %c6, %c0_31] : memref<4x8x256xf32, #tpu.memory_space<vmem>>, vector<4x1x256xf32>
    %31 = vector.shape_cast %30 : vector<4x1x256xf32> to vector<4x256xf32>
    %c6_32 = arith.constant 6 : index
    %c0_33 = arith.constant 0 : index
    %c0_34 = arith.constant 0 : index
    %32 = vector.load %arg1[%c6_32, %c0_33, %c0_34] : memref<8x4x256xf32, #tpu.memory_space<vmem>>, vector<1x4x256xf32>
    %33 = vector.shape_cast %32 : vector<1x4x256xf32> to vector<4x256xf32>
    %34 = vector.shape_cast %31 : vector<4x256xf32> to vector<1x4x256xf32>
    tpu.vector_store %arg1[%c6_32, %c0_33, %c0_34], %34 {strides = array<i32>} : memref<8x4x256xf32, #tpu.memory_space<vmem>>, vector<1x4x256xf32>,
    %c0_35 = arith.constant 0 : index
    %c7 = arith.constant 7 : index
    %c0_36 = arith.constant 0 : index
    %35 = vector.load %arg0[%c0_35, %c7, %c0_36] : memref<4x8x256xf32, #tpu.memory_space<vmem>>, vector<4x1x256xf32>
    %36 = vector.shape_cast %35 : vector<4x1x256xf32> to vector<4x256xf32>
    %c7_37 = arith.constant 7 : index
    %c0_38 = arith.constant 0 : index
    %c0_39 = arith.constant 0 : index
    %37 = vector.load %arg1[%c7_37, %c0_38, %c0_39] : memref<8x4x256xf32, #tpu.memory_space<vmem>>, vector<1x4x256xf32>
    %38 = vector.shape_cast %37 : vector<1x4x256xf32> to vector<4x256xf32>
    %39 = vector.shape_cast %36 : vector<4x256xf32> to vector<1x4x256xf32>
    tpu.vector_store %arg1[%c7_37, %c0_38, %c0_39], %39 {strides = array<i32>} : memref<8x4x256xf32, #tpu.memory_space<vmem>>, vector<1x4x256xf32>,
    return
  }
}

</mosaic_0001>

<bundles_post_ra>
// kernel: tpu_custom_call.1
= control target key start
LH: loop header
LB: loop body
LE: loop exit
PB: predicated region body
PF: predicated region fallthrough
CT: control target
= control target key end

     0   :  { %6 = vsyncpa [#allocation3], 0  ;;  %s472_s0 = inlined_call_operand.hbm [shape: f32[4,8,256], index: 0, kind: input, shape index: {}]   ;;  %s473_s1 = inlined_call_operand.hbm [shape: f32[8,4,256], index: 1, kind: output, shape index: {}]  }
   0x1   :  { %7 = vsyncpa [#allocation4], 0  ;;  %s413_s6 = smov [#allocation2]   ;;  %s365_s10 = scalar_lea.hbm %s472_s0, 1024 }
   0x2   :  { %s13_s7 = sshll.u32 %s413_s6, 4  ;;  %p366_p0 = scmp.ne.s32.totalorder %s472_s0, %s365_s10  ;;  %s14_s7 = int_to_ptr.vmem [resolvable:$true] %s13_s7 }
   0x3   :  { %p369_p1 = scmp.lt.u32.totalorder %s365_s10, %s472_s0 }
   0x5   :  { %p371_p2 = pnand %p369_p1, %p366_p0 }
   0x7   :  { %374 = shalt.err (!%p371_p2)
}
   0x8   :  { %s375_s15 = scalar_lea.vmem %s14_s7, 1024  ;;  %p380_p4 = scmp.lt.s32.totalorder %s14_s7, %s14_s7 }
   0x9   :  { %p376_p3 = scmp.ne.s32.totalorder %s14_s7, %s375_s15  ;;  %p381_p5 = scmp.lt.s32.totalorder %s375_s15, %s375_s15 }
   0xb   :  { %p382_p6 = por %p381_p5, %p380_p4 }
   0xd   :  { %p383_p7 = pnand %p382_p6, %p376_p3 }
   0xf   :  { %386 = shalt.err (!%p383_p7)
}
  0x10   :  { %s414_s16 = smov 256   ;;  %s415_s17 = smov 16  }
  0x11   :  { %19 = dma.hbm_to_vmem [thread:$0]  %s472_s0, 1024, %s14_s7, [#allocation3], %s414_s16, %s414_s16, %s415_s17  }
  0x12   :  { %409 = dma.done.wait [#allocation3], 1024  }
  0x13   :  { %410 = vsyncadd [#allocation3], 4294966272  ;;  %v39_v0 = vlaneseq  ;;  %v416_v1 = vmov 1935823168   ;;  %s417_s0 = smov [#allocation5]  }
  0x14   :  { %v37_v2 = vunpack.c.l.s4 %v416_v1  ;;  %v23_v5 = vld [vmem:[#allocation2] ss:$8 sm:$0x3]  ;;  %v25_v6 = vld [vmem:[#allocation2 + $0x10] ss:$8 sm:$0x3] }
  0x15   :  { %v40_v4 = vshrl.u32 %v39_v0, 7  ;;  %v27_v8 = vld [vmem:[#allocation2 + $0x20] ss:$8 sm:$0x3]  ;;  %s338_s20 = sshll.u32 %s417_s0, 4  ;;  %s339_s20 = int_to_ptr.vmem [resolvable:$true] %s338_s20 }
  0x16   :  { %v38_v3 = vunpack.c.0.s8 %v37_v2  ;;  %v29_v9 = vld [vmem:[#allocation2 + $0x30] ss:$8 sm:$0x3]  ;;  %v34_v10 = vcombine.low %v23_v5, %v27_v8  ;;  %v61_v12 = vld [vmem:[#allocation2 + $0x1] ss:$8 sm:$0x3]  ;;  %p392_p9 = scmp.lt.s32.totalorder %s339_s20, %s339_s20 }
  0x17   :  { %v35_v11 = vcombine.low %v25_v6, %v29_v9  ;;  %v63_v13 = vld [vmem:[#allocation2 + $0x11] ss:$8 sm:$0x3]  ;;  %v65_v14 = vld [vmem:[#allocation2 + $0x21] ss:$8 sm:$0x3] }
  0x18   :  { %v442_v7 = vsub.s32 %v38_v3, %v40_v4  ;;  %v67_v15 = vld [vmem:[#allocation2 + $0x31] ss:$8 sm:$0x3]  ;;  %v72_v18 = vcombine.low %v61_v12, %v65_v14  ;;  %v100_v20 = vld [vmem:[#allocation2 + $0x2] ss:$8 sm:$0x3] }
  0x19   :  { %v73_v19 = vcombine.low %v63_v13, %v67_v15  ;;  %v102_v21 = vld [vmem:[#allocation2 + $0x12] ss:$8 sm:$0x3]  ;;  %v104_v22 = vld [vmem:[#allocation2 + $0x22] ss:$8 sm:$0x3] }
  0x1a   :  { %v42_v16 = vrot.slane %v34_v10, %v442_v7  ;;  %v49_v17 = vrot.slane %v35_v11, %v442_v7  ;;  %v106_v23 = vld [vmem:[#allocation2 + $0x32] ss:$8 sm:$0x3]  ;;  %v80_v25 = vrot.slane %v72_v18, %v442_v7  ;;  %v111_v27 = vcombine.low %v100_v20, %v104_v22  ;;  %v139_v28 = vld [vmem:[#allocation2 + $0x3] ss:$8 sm:$0x3] }
  0x1b   :  { %v87_v26 = vrot.slane %v73_v19, %v442_v7  ;;  %v141_v29 = vld [vmem:[#allocation2 + $0x13] ss:$8 sm:$0x3]  ;;  %v112_v30 = vcombine.low %v102_v21, %v106_v23  ;;  %v143_v31 = vld [vmem:[#allocation2 + $0x23] ss:$8 sm:$0x3] }
  0x1c   :  { %v50_v24 = vcombine.low %v42_v16, %v49_v17  ;;  %v145_v32 = vld [vmem:[#allocation2 + $0x33] ss:$8 sm:$0x3]  ;;  %v119_v34 = vrot.slane %v111_v27, %v442_v7  ;;  %v150_v35 = vcombine.low %v139_v28, %v143_v31  ;;  %v178_v37 = vld [vmem:[#allocation2 + $0x4] ss:$8 sm:$0x3] }
  0x1d   :  { %v88_v33 = vcombine.low %v80_v25, %v87_v26  ;;  %v151_v36 = vcombine.low %v141_v29, %v145_v32  ;;  %v180_v38 = vld [vmem:[#allocation2 + $0x14] ss:$8 sm:$0x3]  ;;  %v126_v39 = vrot.slane %v112_v30, %v442_v7  ;;  %v182_v40 = vld [vmem:[#allocation2 + $0x24] ss:$8 sm:$0x3] }
  0x1e   :  { %350 = vst.sshfl [vmem:[#allocation5] sm:$0xff pattern:$0x75316420] %v50_v24  ;;  %v184_v41 = vld [vmem:[#allocation2 + $0x34] ss:$8 sm:$0x3]  ;;  %v158_v42 = vrot.slane %v150_v35, %v442_v7  ;;  %v189_v44 = vcombine.low %v178_v37, %v182_v40 }
  0x1f   :  { %351 = vst.sshfl [vmem:[#allocation5 + $0x8] sm:$0xff pattern:$0x75316420] %v88_v33  ;;  %v165_v43 = vrot.slane %v151_v36, %v442_v7  ;;  %v190_v45 = vcombine.low %v180_v38, %v184_v41  ;;  %v217_v46 = vld [vmem:[#allocation2 + $0x5] ss:$8 sm:$0x3]  ;;  %v127_v48 = vcombine.low %v119_v34, %v126_v39 }
  0x20   :  { %v219_v47 = vld [vmem:[#allocation2 + $0x15] ss:$8 sm:$0x3]  ;;  %v221_v49 = vld [vmem:[#allocation2 + $0x25] ss:$8 sm:$0x3]  ;;  %v197_v52 = vrot.slane %v189_v44, %v442_v7 }
  0x21   :  { %v223_v50 = vld [vmem:[#allocation2 + $0x35] ss:$8 sm:$0x3]  ;;  %v166_v51 = vcombine.low %v158_v42, %v165_v43  ;;  %v204_v53 = vrot.slane %v190_v45, %v442_v7  ;;  %v228_v54 = vcombine.low %v217_v46, %v221_v49  ;;  %v256_v55 = vld [vmem:[#allocation2 + $0x6] ss:$8 sm:$0x3] }
  0x22   :  { %v258_v56 = vld [vmem:[#allocation2 + $0x16] ss:$8 sm:$0x3]  ;;  %352 = vst.sshfl [vmem:[#allocation5 + $0x10] sm:$0xff pattern:$0x75316420] %v127_v48  ;;  %v229_v57 = vcombine.low %v219_v47, %v223_v50 }
  0x23   :  { %v260_v58 = vld [vmem:[#allocation2 + $0x26] ss:$8 sm:$0x3]  ;;  %v262_v59 = vld [vmem:[#allocation2 + $0x36] ss:$8 sm:$0x3]  ;;  %v205_v60 = vcombine.low %v197_v52, %v204_v53  ;;  %v236_v61 = vrot.slane %v228_v54, %v442_v7 }
  0x24   :  { %353 = vst.sshfl [vmem:[#allocation5 + $0x18] sm:$0xff pattern:$0x75316420] %v166_v51  ;;  %v267_v62 = vcombine.low %v256_v55, %v260_v58  ;;  %v268_v63 = vcombine.low %v258_v56, %v262_v59  ;;  %v295_v0 = vld [vmem:[#allocation2 + $0x7] ss:$8 sm:$0x3]  ;;  %v243_v2 = vrot.slane %v229_v57, %v442_v7 }
  0x25   :  { %v297_v1 = vld [vmem:[#allocation2 + $0x17] ss:$8 sm:$0x3]  ;;  %v299_v3 = vld [vmem:[#allocation2 + $0x27] ss:$8 sm:$0x3] }
  0x26   :  { %v301_v4 = vld [vmem:[#allocation2 + $0x37] ss:$8 sm:$0x3]  ;;  %354 = vst.sshfl [vmem:[#allocation5 + $0x20] sm:$0xff pattern:$0x75316420] %v205_v60  ;;  %v275_v5 = vrot.slane %v267_v62, %v442_v7  ;;  %v282_v6 = vrot.slane %v268_v63, %v442_v7  ;;  %v306_v8 = vcombine.low %v295_v0, %v299_v3  ;;  %v244_v10 = vcombine.low %v236_v61, %v243_v2 }
  0x27   :  { %v307_v9 = vcombine.low %v297_v1, %v301_v4  ;;  %s387_s21 = scalar_lea.vmem %s339_s20, 1024 }
  0x28   :  { %v283_v11 = vcombine.low %v275_v5, %v282_v6  ;;  %v314_v12 = vrot.slane %v306_v8, %v442_v7  ;;  %355 = vst.sshfl [vmem:[#allocation5 + $0x28] sm:$0xff pattern:$0x75316420] %v244_v10  ;;  %p388_p8 = scmp.ne.s32.totalorder %s339_s20, %s387_s21  ;;  %p393_p10 = scmp.lt.s32.totalorder %s387_s21, %s387_s21 }
  0x29   :  { %v321_v13 = vrot.slane %v307_v9, %v442_v7 }
  0x2a   :  { %356 = vst.sshfl [vmem:[#allocation5 + $0x30] sm:$0xff pattern:$0x75316420] %v283_v11  ;;  %p394_p11 = por %p393_p10, %p392_p9 }
  0x2b   :  { %v322_v14 = vcombine.low %v314_v12, %v321_v13 }
  0x2c   :  { %p395_p12 = pnand %p394_p11, %p388_p8 }
  0x2d   :  { %357 = vst.sshfl [vmem:[#allocation5 + $0x38] sm:$0xff pattern:$0x75316420] %v322_v14 }
  0x2e   :  { %398 = shalt.err (!%p395_p12)
}
  0x2f   :  { %s399_s24 = scalar_lea.hbm %s473_s1, 1024 }
  0x30   :  { %p400_p13 = scmp.ne.s32.totalorder %s473_s1, %s399_s24  ;;  %p403_p0 = scmp.lt.u32.totalorder %s399_s24, %s473_s1 }
  0x32   :  { %p405_p1 = pnand %p403_p0, %p400_p13 }
  0x34   :  { %408 = shalt.err (!%p405_p1)
}
  0x35   :  { %s418_s29 = smov 128   ;;  %s419_s30 = smov 8  }
  0x36   :  { %344 = dma.vmem_to_hbm [thread:$0]  %s339_s20, 1024, %s473_s1, [#allocation4], %s418_s29, %s418_s29, %s419_s30  }
  0x37   :  { %411 = dma.done.wait [#allocation4], 1024  }
  0x38   :  { %412 = vsyncadd [#allocation4], 4294966272 }
  0x39   :  { %348 = vsyncpa [#allocation3], 1 }
  0x3a   :  { %349 = vsyncpa [#allocation4], 1 }

</bundles_post_ra>
